<compile_context>
chip_gen: v7x
topology: tpu7x:2x2x1
jax: 0.10.0
libtpu: 0.0.40
codegen_flags: <defaults>
</compile_context>

<pallas_src>
import functools
import math

import jax
import jax.numpy as jnp
from jax.experimental import pallas as pl
from jax.experimental.pallas import tpu as pltpu

HM_WEIGHT = 1.0
WH_WEIGHT = 0.1
OFF_WEIGHT = 1.0
NUM_STACKS = 1

_EPS = 1e-4
_LOG_EPS = math.log(_EPS)
_LOG_1M_EPS = math.log(1.0 - _EPS)

_VMEM_LIMIT = 48 * 1024 * 1024  # headroom even on v7x (64 MiB physical)


def _round_up(x, m):
    return ((x + m - 1) // m) * m


# ------------------------------- focal kernel --------------------------------

def _focal_kernel(logit_ref, gt_ref, out_ref, *, rows, cols):
    """One (tile_r, tile_c) tile of the CenterNet modified focal loss.

    Emits two per-tile partials into a (1, 1, 8, 128) block:
      sublane 0 = pos_loss_sum + neg_loss_sum   (read lane 0 in glue)
      sublane 1 = num_pos
    """
    x = logit_ref[...].astype(jnp.float32)
    gt = gt_ref[...].astype(jnp.float32)
    tr, tc = x.shape

    # sigmoid + PyTorch _sigmoid() 1e-4 clamp, minimal transcendental count:
    #   e = exp(-x); sigmoid = 1/(1+e); log(sigmoid) = -log(1+e);
    #   log(1-sigmoid) = -x - log(1+e)
    e = jnp.exp(-x)                               # EUP
    one_plus_e = 1.0 + e
    inv = pl.reciprocal(one_plus_e, approx=True)  # EUP slot (VALU has no slack)
    sp = jnp.log(one_plus_e)                      # EUP

    pred = jnp.clip(inv, _EPS, 1.0 - _EPS)
    lo = inv <= _EPS
    hi = inv >= 1.0 - _EPS
    log_pred = jnp.where(lo, _LOG_EPS, jnp.where(hi, _LOG_1M_EPS, -sp))
    log_1mpred = jnp.where(lo, _LOG_1M_EPS, jnp.where(hi, _LOG_EPS, -x - sp))

    is_pos = gt == 1.0
    omp = 1.0 - pred
    neg_w = (1.0 - gt) ** 4
    # Fused per-element focal loss: pos branch where gt==1, neg branch where
    # gt<1, 0 elsewhere (the "elsewhere" case only exists for padded pixels).
    loss_elem = jnp.where(
        is_pos, log_pred * omp * omp,
        jnp.where(gt < 1.0, log_1mpred * pred * pred * neg_w, 0.0))
    pos_mask = is_pos

    # Ragged-edge masking; emitted at trace time only when tiles don't divide
    # the array, so the common divisible case pays no extra VALU ops.
    if (rows % tr != 0) or (cols % tc != 0):
        valid = None
        if rows % tr != 0:
            rid = (pl.program_id(0) * tr
                   + jax.lax.broadcasted_iota(jnp.int32, (tr, tc), 0))
            valid = rid < rows
        if cols % tc != 0:
            cid = (pl.program_id(1) * tc
                   + jax.lax.broadcasted_iota(jnp.int32, (tr, tc), 1))
            cm = cid < cols
            valid = cm if valid is None else (valid & cm)
        loss_elem = jnp.where(valid, loss_elem, 0.0)
        pos_mask = pos_mask & valid

    total = jnp.sum(loss_elem)
    npos = jnp.sum(jnp.where(pos_mask, 1.0, 0.0))

    sub = jax.lax.broadcasted_iota(jnp.int32, (8, 128), 0)
    blk = jnp.where(sub == 0, total, jnp.where(sub == 1, npos, 0.0))
    out_ref[...] = blk.reshape(1, 1, 8, 128)


def _focal_sums(logits2d, gt2d, *, tile_r_max=256, tile_c_max=2048):
    """Tiled focal loss; returns (total_loss_sum, num_pos)."""
    rows, cols = logits2d.shape
    tile_r = min(tile_r_max, _round_up(rows, 8))
    tile_c = min(tile_c_max, _round_up(cols, 128))
    gr = -(-rows // tile_r)
    gc = -(-cols // tile_c)

    parts = pl.pallas_call(
        functools.partial(_focal_kernel, rows=rows, cols=cols),
        out_shape=jax.ShapeDtypeStruct((gr, gc, 8, 128), jnp.float32),
        grid=(gr, gc),
        in_specs=[pl.BlockSpec((tile_r, tile_c), lambda r, c: (r, c)),
                  pl.BlockSpec((tile_r, tile_c), lambda r, c: (r, c))],
        out_specs=pl.BlockSpec((1, 1, 8, 128), lambda r, c: (r, c, 0, 0)),
        compiler_params=pltpu.CompilerParams(
            dimension_semantics=("parallel", "parallel"),
            vmem_limit_bytes=_VMEM_LIMIT),
    )(logits2d, gt2d)

    total = jnp.sum(parts[:, :, 0, 0])
    num_pos = jnp.sum(parts[:, :, 1, 0])
    return total, num_pos


# -------------------------------- RegL1 kernel --------------------------------

def _regl1_kernel(ind_ref, feat_ref, mask_ref, tgt_ref, out_ref, *, wh_chans):
    """Fused RegL1 for the stacked (wh, reg) heads via a direct gather.

    ind_ref  : SMEM (B, K) int32 (scalar prefetch) -- flat spatial indices.
    feat_ref : VMEM (J, C4, 128) -- this batch element's stacked feature maps,
               flat index hw = j * 128 + lane.
    mask_ref : VMEM (1, K)
    tgt_ref  : VMEM (C4, K) -- stacked targets, channel-major.
    out_ref  : VMEM (8, 128) -- sublane 0 = wh L1 sum, sublane 1 = off L1 sum.
    """
    b = pl.program_id(0)
    _, c4, _ = feat_ref.shape
    k_count = mask_ref.shape[-1]

    lane = jax.lax.broadcasted_iota(jnp.int32, (1, 128), 1)       # hoisted
    kpos = jax.lax.broadcasted_iota(jnp.int32, (1, k_count), 1)   # hoisted

    def gather_one(k, acc):
        idx = ind_ref[b, k]                          # SMEM scalar read
        j = idx // 128
        l = idx - j * 128
        chunk = feat_ref[j].astype(jnp.float32)      # (C4, 128) dyn. leading idx
        col = jnp.sum(jnp.where(lane == l, chunk, 0.0),
                      axis=1, keepdims=True)         # (C4, 1)
        return acc + col * (kpos == k).astype(jnp.float32)  # scatter into col k

    # pred[c, k] = feat[c, ind[b, k]]
    pred = jax.lax.fori_loop(0, k_count, gather_one,
                             jnp.zeros((c4, k_count), jnp.float32))

    m = mask_ref[...].astype(jnp.float32)            # (1, K)
    tgt = tgt_ref[...].astype(jnp.float32)           # (C4, K)
    diff = jnp.abs(pred * m - tgt * m)
    crow = jax.lax.broadcasted_iota(jnp.int32, (c4, k_count), 0)
    wh_l1 = jnp.sum(jnp.where(crow < wh_chans, diff, 0.0))
    off_l1 = jnp.sum(jnp.where(crow >= wh_chans, diff, 0.0))

    sub = jax.lax.broadcasted_iota(jnp.int32, (8, 128), 0)
    out_ref[...] = jnp.where(sub == 0, wh_l1, jnp.where(sub == 1, off_l1, 0.0))


def _regl1_fused_sums(wh, reg, ind, mask, tgt_wh, tgt_reg):
    """Fused wh+reg RegL1; returns (wh_l1_sum, off_l1_sum, expanded_mask_sum)."""
    B = wh.shape[0]
    HW = wh.shape[2] * wh.shape[3]
    K = ind.shape[1]
    C4 = 4

    feat = jnp.concatenate([wh.reshape(B, 2, HW), reg.reshape(B, 2, HW)], axis=1)
    hw_pad = _round_up(HW, 128)
    if hw_pad != HW:
        # ind < HW always, so padded lanes are never selected by the gather.
        feat = jnp.pad(feat, ((0, 0), (0, 0), (0, hw_pad - HW)))
    n_j = hw_pad // 128
    # (B, J, C4, 128): turns the gather into a dynamic leading-dim index plus a
    # 128-lane select -- no (B,K,HW) one-hot, no MXU pass, tiny VMEM footprint.
    feat4 = feat.reshape(B, C4, n_j, 128).transpose(0, 2, 1, 3)

    tgt = jnp.transpose(jnp.concatenate([tgt_wh, tgt_reg], axis=2), (0, 2, 1))
    mask3 = mask.reshape(B, 1, K)

    out = pl.pallas_call(
        functools.partial(_regl1_kernel, wh_chans=2),
        out_shape=jax.ShapeDtypeStruct((B, 8, 128), jnp.float32),
        grid_spec=pltpu.PrefetchScalarGridSpec(
            num_scalar_prefetch=1,
            grid=(B,),
            in_specs=[
                pl.BlockSpec((None, n_j, C4, 128), lambda b, ind_sm: (b, 0, 0, 0)),
                pl.BlockSpec((None, 1, K), lambda b, ind_sm: (b, 0, 0)),
                pl.BlockSpec((None, C4, K), lambda b, ind_sm: (b, 0, 0)),
            ],
            out_specs=pl.BlockSpec((None, 8, 128), lambda b, ind_sm: (b, 0, 0)),
        ),
        compiler_params=pltpu.CompilerParams(
            dimension_semantics=("parallel",),
            vmem_limit_bytes=_VMEM_LIMIT),
    )(ind.astype(jnp.int32), feat4, mask3, tgt)

    wh_l1 = jnp.sum(out[:, 0, 0])
    off_l1 = jnp.sum(out[:, 1, 0])
    mask_sum = jnp.sum(mask.astype(jnp.float32)) * 2.0   # mask expanded to (B,K,2)
    return wh_l1, off_l1, mask_sum


# ------------------------------ CtdetLoss forward -----------------------------

def ctdet_loss(outputs, batch):
    output = outputs[0]
    hm_logit = output['hm']          # (B, C, H, W)  raw logits (before _sigmoid)
    wh = output['wh']                # (B, 2, H, W)
    reg = output['reg']              # (B, 2, H, W)

    B, C, H, W = hm_logit.shape
    HW = H * W

    # --- FocalLoss on sigmoid-clamped heatmap (tiled, fused, two partials) ---
    total, num_pos = _focal_sums(hm_logit.reshape(B * C, HW),
                                 batch['hm'].reshape(B * C, HW))
    # pos_sum == 0 whenever num_pos == 0, so -total == -neg_sum in that branch.
    hm_loss = jnp.where(num_pos > 0.0,
                        -total / jnp.maximum(num_pos, 1.0),
                        -total)
    hm_loss = hm_loss / NUM_STACKS

    # --- Fused RegL1Loss for wh + reg (offset) heads (direct gather) ---
    wh_l1, off_l1, mask_sum = _regl1_fused_sums(
        wh, reg, batch['ind'], batch['reg_mask'], batch['wh'], batch['reg'])
    wh_loss = (wh_l1 / (mask_sum + 1e-4)) / NUM_STACKS
    off_loss = off_l1 / (mask_sum + 1e-4)

    loss = HM_WEIGHT * hm_loss + WH_WEIGHT * wh_loss + OFF_WEIGHT * off_loss
    loss_stats = {'loss': loss, 'hm_loss': hm_loss,
                  'wh_loss': wh_loss, 'off_loss': off_loss}
    return loss, loss_stats


# ------------------------------ pure-JAX reference ----------------------------

def _ctdet_loss_ref(outputs, batch):
    output = outputs[0]
    pred = jnp.clip(jax.nn.sigmoid(output['hm'].astype(jnp.float32)),
                    1e-4, 1.0 - 1e-4)
    gt = batch['hm'].astype(jnp.float32)
    pos = (gt == 1.0).astype(jnp.float32)
    neg = (gt < 1.0).astype(jnp.float32)
    neg_w = (1.0 - gt) ** 4
    pos_loss = jnp.sum(jnp.log(pred) * (1.0 - pred) ** 2 * pos)
    neg_loss = jnp.sum(jnp.log(1.0 - pred) * pred ** 2 * neg_w * neg)
    num_pos = jnp.sum(pos)
    hm_loss = jnp.where(num_pos == 0.0, -neg_loss, -(pos_loss + neg_loss) / num_pos)

    def reg_l1(feat_nchw, mask, ind, target):
        Bb, Cc, Hh, Ww = feat_nchw.shape
        f = feat_nchw.astype(jnp.float32).transpose(0, 2, 3, 1).reshape(Bb, Hh * Ww, Cc)
        idx = jnp.broadcast_to(ind[:, :, None], (Bb, ind.shape[1], Cc)).astype(jnp.int32)
        p = jnp.take_along_axis(f, idx, axis=1)
        m = mask[:, :, None].astype(jnp.float32)
        l1 = jnp.sum(jnp.abs(p * m - target.astype(jnp.float32) * m))
        return l1 / (jnp.sum(jnp.broadcast_to(m, p.shape)) + 1e-4)

    wh_loss = reg_l1(output['wh'], batch['reg_mask'], batch['ind'], batch['wh'])
    off_loss = reg_l1(output['reg'], batch['reg_mask'], batch['ind'], batch['reg'])
    loss = HM_WEIGHT * hm_loss + WH_WEIGHT * wh_loss + OFF_WEIGHT * off_loss
    return loss, {'loss': loss, 'hm_loss': hm_loss,
                  'wh_loss': wh_loss, 'off_loss': off_loss}


# ----------------------------------- main --------------------------------------

if __name__ == "__main__":
    B, C, H, W, K = 2, 4, 16, 16, 8
    key = jax.random.PRNGKey(0)
    k1, k2, k3, k4, k5, k6, k7 = jax.random.split(key, 7)

    hm_logit = jax.random.normal(k1, (B, C, H, W), jnp.float32)
    wh_pred = jax.random.normal(k2, (B, 2, H, W), jnp.float32)
    reg_pred = jax.random.normal(k3, (B, 2, H, W), jnp.float32)

    gt_hm = jax.random.uniform(k4, (B, C, H, W), jnp.float32, 0.0, 0.99)
    gt_hm = gt_hm.at[0, 1, 3, 5].set(1.0).at[1, 2, 7, 9].set(1.0)   # exact peaks

    ind = jax.random.randint(k5, (B, K), 0, H * W, jnp.int32)
    reg_mask = (jax.lax.broadcasted_iota(jnp.int32, (B, K), 1) < 5).astype(jnp.float32)
    gt_wh = jax.random.uniform(k6, (B, K, 2), jnp.float32, 0.0, 8.0)
    gt_reg = jax.random.uniform(k7, (B, K, 2), jnp.float32, 0.0, 1.0)

    outputs = [{'hm': hm_logit, 'wh': wh_pred, 'reg': reg_pred}]
    batch = {'hm': gt_hm, 'reg_mask': reg_mask, 'ind': ind,
             'wh': gt_wh, 'reg': gt_reg}

    loss, stats = ctdet_loss(outputs, batch)
    jax.block_until_ready(loss)

    ref_loss, ref_stats = _ctdet_loss_ref(outputs, batch)
    for name in ('loss', 'hm_loss', 'wh_loss', 'off_loss'):
        a, b = float(stats[name]), float(ref_stats[name])
        assert abs(a - b) <= 1e-3 * max(1.0, abs(b)), (name, a, b)

    print("KERNEL_OK")
</pallas_src>

<mosaic_0001>
module attributes {stable_mosaic.version = 11 : i64} {
  func.func @_focal_kernel(%arg0: i32, %arg1: i32, %arg2: memref<8x256xf32, #tpu.memory_space<vmem>>, %arg3: memref<8x256xf32, #tpu.memory_space<vmem>>, %arg4: memref<1x1x8x128xf32, #tpu.memory_space<vmem>>) attributes {dimension_semantics = [#tpu.dimension_semantics<parallel>, #tpu.dimension_semantics<parallel>], iteration_bounds = array<i64: 1, 1>, scalar_prefetch = 0 : i64, scratch_operands = 0 : i64, tpu.core_type = #tpu.core_type<tc>, window_params = [{transform_indices = @transform_0, window_bounds = array<i64: 8, 256>}, {transform_indices = @transform_1, window_bounds = array<i64: 8, 256>}, {transform_indices = @transform_2, window_bounds = array<i64: 1, 1, 8, 128>}]} {
    %c0 = arith.constant 0 : index
    %c0_0 = arith.constant 0 : index
    %0 = vector.load %arg2[%c0, %c0_0] : memref<8x256xf32, #tpu.memory_space<vmem>>, vector<8x256xf32>
    %c0_1 = arith.constant 0 : index
    %c0_2 = arith.constant 0 : index
    %1 = vector.load %arg3[%c0_1, %c0_2] : memref<8x256xf32, #tpu.memory_space<vmem>>, vector<8x256xf32>
    %cst = arith.constant 0.000000e+00 : f32
    %2 = vector.broadcast %cst : f32 to vector<8x256xf32>
    %3 = arith.subf %2, %0 : vector<8x256xf32>
    %4 = math.exp %3 : vector<8x256xf32>
    %cst_3 = arith.constant 1.000000e+00 : f32
    %5 = vector.broadcast %cst_3 : f32 to vector<8x256xf32>
    %6 = arith.addf %5, %4 : vector<8x256xf32>
    %7 = tpu.reciprocal %6 {approx = true} : vector<8x256xf32> -> vector<8x256xf32>
    %8 = math.log %6 : vector<8x256xf32>
    %cst_4 = arith.constant 9.99999974E-5 : f32
    %cst_5 = arith.constant 0.999899983 : f32
    %9 = vector.broadcast %cst_4 : f32 to vector<8x256xf32>
    %10 = arith.maximumf %9, %7 : vector<8x256xf32>
    %11 = vector.broadcast %cst_5 : f32 to vector<8x256xf32>
    %12 = arith.minimumf %11, %10 : vector<8x256xf32>
    %cst_6 = arith.constant 9.99999974E-5 : f32
    %13 = vector.broadcast %cst_6 : f32 to vector<8x256xf32>
    %14 = arith.cmpf ole, %7, %13 : vector<8x256xf32>
    %cst_7 = arith.constant 0.999899983 : f32
    %15 = vector.broadcast %cst_7 : f32 to vector<8x256xf32>
    %16 = arith.cmpf oge, %7, %15 : vector<8x256xf32>
    %cst_8 = arith.constant 0.000000e+00 : f32
    %17 = vector.broadcast %cst_8 : f32 to vector<8x256xf32>
    %18 = arith.subf %17, %8 : vector<8x256xf32>
    %cst_9 = arith.constant -1.000050e-04 : f32
    %19 = vector.broadcast %cst_9 : f32 to vector<8x256xf32>
    %20 = arith.select %16, %19, %18 : vector<8x256xi1>, vector<8x256xf32>
    %cst_10 = arith.constant -9.21034049 : f32
    %21 = vector.broadcast %cst_10 : f32 to vector<8x256xf32>
    %22 = arith.select %14, %21, %20 : vector<8x256xi1>, vector<8x256xf32>
    %cst_11 = arith.constant 0.000000e+00 : f32
    %23 = vector.broadcast %cst_11 : f32 to vector<8x256xf32>
    %24 = arith.subf %23, %0 : vector<8x256xf32>
    %25 = arith.subf %24, %8 : vector<8x256xf32>
    %cst_12 = arith.constant -9.21034049 : f32
    %26 = vector.broadcast %cst_12 : f32 to vector<8x256xf32>
    %27 = arith.select %16, %26, %25 : vector<8x256xi1>, vector<8x256xf32>
    %cst_13 = arith.constant -1.000050e-04 : f32
    %28 = vector.broadcast %cst_13 : f32 to vector<8x256xf32>
    %29 = arith.select %14, %28, %27 : vector<8x256xi1>, vector<8x256xf32>
    %cst_14 = arith.constant 1.000000e+00 : f32
    %30 = vector.broadcast %cst_14 : f32 to vector<8x256xf32>
    %31 = arith.cmpf oeq, %1, %30 : vector<8x256xf32>
    %cst_15 = arith.constant 1.000000e+00 : f32
    %32 = vector.broadcast %cst_15 : f32 to vector<8x256xf32>
    %33 = arith.subf %32, %12 : vector<8x256xf32>
    %cst_16 = arith.constant 1.000000e+00 : f32
    %34 = vector.broadcast %cst_16 : f32 to vector<8x256xf32>
    %35 = arith.subf %34, %1 : vector<8x256xf32>
    %36 = arith.mulf %35, %35 : vector<8x256xf32>
    %37 = arith.mulf %36, %36 : vector<8x256xf32>
    %38 = arith.mulf %22, %33 : vector<8x256xf32>
    %39 = arith.mulf %38, %33 : vector<8x256xf32>
    %cst_17 = arith.constant 1.000000e+00 : f32
    %40 = vector.broadcast %cst_17 : f32 to vector<8x256xf32>
    %41 = arith.cmpf olt, %1, %40 : vector<8x256xf32>
    %42 = arith.mulf %29, %12 : vector<8x256xf32>
    %43 = arith.mulf %42, %12 : vector<8x256xf32>
    %44 = arith.mulf %43, %37 : vector<8x256xf32>
    %cst_18 = arith.constant 0.000000e+00 : f32
    %45 = vector.broadcast %cst_18 : f32 to vector<8x256xf32>
    %46 = arith.select %41, %44, %45 : vector<8x256xi1>, vector<8x256xf32>
    %47 = arith.select %31, %39, %46 : vector<8x256xi1>, vector<8x256xf32>
    %48 = vector.shape_cast %47 : vector<8x256xf32> to vector<1x8x256xf32>
    %cst_19 = arith.constant dense<0.000000e+00> : vector<1xf32>
    %49 = vector.multi_reduction <add>, %48, %cst_19 [1, 2] : vector<1x8x256xf32> to vector<1xf32>
    %50 = vector.shape_cast %49 : vector<1xf32> to vector<1x1x1xf32>
    %51 = vector.extract %50[0, 0, 0] : f32 from vector<1x1x1xf32>
    %cst_20 = arith.constant 1.000000e+00 : f32
    %cst_21 = arith.constant 0.000000e+00 : f32
    %52 = vector.broadcast %cst_20 : f32 to vector<8x256xf32>
    %53 = vector.broadcast %cst_21 : f32 to vector<8x256xf32>
    %54 = arith.select %31, %52, %53 : vector<8x256xi1>, vector<8x256xf32>
    %55 = vector.shape_cast %54 : vector<8x256xf32> to vector<1x8x256xf32>
    %cst_22 = arith.constant dense<0.000000e+00> : vector<1xf32>
    %56 = vector.multi_reduction <add>, %55, %cst_22 [1, 2] : vector<1x8x256xf32> to vector<1xf32>
    %57 = vector.shape_cast %56 : vector<1xf32> to vector<1x1x1xf32>
    %58 = vector.extract %57[0, 0, 0] : f32 from vector<1x1x1xf32>
    %59 = tpu.iota {dimensions = array<i32: 0>} : vector<8x128xi32>
    %c0_i32 = arith.constant 0 : i32
    %60 = vector.broadcast %c0_i32 : i32 to vector<8x128xi32>
    %61 = arith.cmpi eq, %59, %60 : vector<8x128xi32>
    %c1_i32 = arith.constant 1 : i32
    %62 = vector.broadcast %c1_i32 : i32 to vector<8x128xi32>
    %63 = arith.cmpi eq, %59, %62 : vector<8x128xi32>
    %cst_23 = arith.constant 0.000000e+00 : f32
    %64 = vector.broadcast %58 : f32 to vector<8x128xf32>
    %65 = vector.broadcast %cst_23 : f32 to vector<8x128xf32>
    %66 = arith.select %63, %64, %65 : vector<8x128xi1>, vector<8x128xf32>
    %67 = vector.broadcast %51 : f32 to vector<8x128xf32>
    %68 = arith.select %61, %67, %66 : vector<8x128xi1>, vector<8x128xf32>
    %69 = vector.shape_cast %68 : vector<8x128xf32> to vector<1x1x8x128xf32>
    %c0_24 = arith.constant 0 : index
    %c0_25 = arith.constant 0 : index
    %c0_26 = arith.constant 0 : index
    %c0_27 = arith.constant 0 : index
    %70 = vector.load %arg4[%c0_24, %c0_25, %c0_26, %c0_27] : memref<1x1x8x128xf32, #tpu.memory_space<vmem>>, vector<1x1x8x128xf32>
    tpu.vector_store %arg4[%c0_24, %c0_25, %c0_26, %c0_27], %69 {strides = array<i32>} : memref<1x1x8x128xf32, #tpu.memory_space<vmem>>, vector<1x1x8x128xf32>,
    return
  }
  func.func @transform_0(%arg0: i32, %arg1: i32) -> (i32, i32) {
    %c0_i32 = arith.constant 0 : i32
    return %arg0, %arg1 : i32, i32
  }
  func.func @transform_1(%arg0: i32, %arg1: i32) -> (i32, i32) {
    %c0_i32 = arith.constant 0 : i32
    return %arg0, %arg1 : i32, i32
  }
  func.func @transform_2(%arg0: i32, %arg1: i32) -> (i32, i32, i32, i32) {
    %c0_i32 = arith.constant 0 : i32
    %c0_i32_0 = arith.constant 0 : i32
    %c0_i32_1 = arith.constant 0 : i32
    return %arg0, %arg1, %c0_i32, %c0_i32_0 : i32, i32, i32, i32
  }
}

</mosaic_0001>

<bundles_post_ra>
// kernel: tpu_custom_call.1
= control target key start
LH: loop header
LB: loop body
LE: loop exit
PB: predicated region body
PF: predicated region fallthrough
CT: control target
= control target key end

     0   :  { %7 = vsyncpa [#allocation3], 0  ;;  %s296_s0 = inlined_call_operand.hbm [shape: f32[8,256], index: 0, kind: input, shape index: {}]   ;;  %s297_s1 = inlined_call_operand.hbm [shape: f32[8,256], index: 1, kind: input, shape index: {}]   ;;  %s298_s2 = inlined_call_operand.hbm [shape: f32[1,1,8,128], index: 2, kind: output, shape index: {}]  }
   0x1   :  { %8 = vsyncpa [#allocation6], 0 }
   0x2   :  { %9 = vsyncpa [#allocation4], 0  ;;  %s239_s9 = smov [#allocation2]   ;;  %s240_s11 = smov [#allocation5]  }
   0x3   :  { %s16_s10 = sshll.u32 %s239_s9, 4  ;;  %s26_s12 = sshll.u32 %s240_s11, 4  ;;  %s17_s10 = int_to_ptr.vmem [resolvable:$true] %s16_s10  ;;  %s27_s12 = int_to_ptr.vmem [resolvable:$true] %s26_s12 }
   0x4   :  { %s167_s15 = scalar_lea.hbm %s296_s0, 256 }
   0x5   :  { %p168_p0 = scmp.ne.s32.totalorder %s296_s0, %s167_s15  ;;  %p171_p1 = scmp.lt.u32.totalorder %s167_s15, %s296_s0 }
   0x7   :  { %p173_p2 = pnand %p171_p1, %p168_p0 }
   0x9   :  { %176 = shalt.err (!%p173_p2)
}
   0xa   :  { %s177_s20 = scalar_lea.vmem %s17_s10, 256  ;;  %p182_p4 = scmp.lt.s32.totalorder %s17_s10, %s17_s10 }
   0xb   :  { %p178_p3 = scmp.ne.s32.totalorder %s17_s10, %s177_s20  ;;  %p183_p5 = scmp.lt.s32.totalorder %s177_s20, %s177_s20 }
   0xd   :  { %p184_p6 = por %p183_p5, %p182_p4 }
   0xf   :  { %p185_p7 = pnand %p184_p6, %p178_p3 }
  0x11   :  { %188 = shalt.err (!%p185_p7)
}
  0x12   :  { %19 = dma.hbm_to_vmem [thread:$0]  %s296_s0, 256, %s17_s10, [#allocation3]  }
  0x13   :  { %s189_s25 = scalar_lea.hbm %s297_s1, 256 }
  0x14   :  { %p190_p8 = scmp.ne.s32.totalorder %s297_s1, %s189_s25  ;;  %p193_p9 = scmp.lt.u32.totalorder %s189_s25, %s297_s1 }
  0x16   :  { %p195_p10 = pnand %p193_p9, %p190_p8 }
  0x18   :  { %198 = shalt.err (!%p195_p10)
}
  0x19   :  { %s199_s30 = scalar_lea.vmem %s27_s12, 256  ;;  %p204_p12 = scmp.lt.s32.totalorder %s27_s12, %s27_s12 }
  0x1a   :  { %p200_p11 = scmp.ne.s32.totalorder %s27_s12, %s199_s30  ;;  %p205_p13 = scmp.lt.s32.totalorder %s199_s30, %s199_s30 }
  0x1c   :  { %p206_p0 = por %p205_p13, %p204_p12 }
  0x1e   :  { %p207_p1 = pnand %p206_p0, %p200_p11 }
  0x20   :  { %210 = shalt.err (!%p207_p1)
}
  0x21   :  { %29 = dma.hbm_to_vmem [thread:$0]  %s297_s1, 256, %s27_s12, [#allocation6]  }
  0x22   :  { %233 = dma.done.wait [#allocation3], 256  }
  0x23   :  { %234 = vsyncadd [#allocation3], 4294967040 }
  0x24   :  { %235 = dma.done.wait [#allocation6], 256  }
  0x25   :  { %236 = vsyncadd [#allocation6], 4294967040  ;;  %v36_v0 = vld [vmem:[#allocation2] sm:$0xff]  ;;  %v37_v1 = vld [vmem:[#allocation2 + $0x8] sm:$0xff]  ;;  %v241_v56 = vmov 0.0   ;;  %s242_s4 = smov [#allocation7]  }
  0x26   :  { %v40_v2 = vsub.f32 0.0, %v36_v0  ;;  %v41_v3 = vsub.f32 0.0, %v37_v1  ;;  %v38_v10 = vld [vmem:[#allocation5] sm:$0xff]  ;;  %v39_v11 = vld [vmem:[#allocation5 + $0x8] sm:$0xff]  ;;  %s137_s5 = sshll.u32 %s242_s4, 4  ;;  %s138_s5 = int_to_ptr.vmem [resolvable:$true] %s137_s5 }
  0x27   :  { %v78_v12 = vsub.f32 1.0, %v38_v10  ;;  %v79_v14 = vsub.f32 1.0, %v39_v11  ;;  %vm88_vm4 = vcmp.lt.f32.partialorder %v38_v10, 1.0  ;;  %vm89_vm5 = vcmp.lt.f32.partialorder %v39_v11, 1.0  ;;  %s211_s7 = scalar_lea.vmem %s138_s5, 128  ;;  %p216_p3 = scmp.lt.s32.totalorder %s138_s5, %s138_s5 }
  0x28   :  { %v42_v4 = vmul.f32 1.442695, %v40_v2  ;;  %v44_v5 = vmul.f32 1.442695, %v41_v3  ;;  %vm74_vm6 = vcmp.eq.f32.partialorder %v38_v10, 1.0  ;;  %vm75_vm7 = vcmp.eq.f32.partialorder %v39_v11, 1.0  ;;  %p212_p2 = scmp.ne.s32.totalorder %s138_s5, %s211_s7  ;;  %p217_p4 = scmp.lt.s32.totalorder %s211_s7, %s211_s7 }
  0x29   :  { %v80_v22 = vmul.f32 %v78_v12, %v78_v12  ;;  %v81_v25 = vmul.f32 %v79_v14, %v79_v14  ;;  %v110_v57 = vsel %vm74_vm6, 1.0, %v241_v56  ;;  %v111_v58 = vsel %vm75_vm7, 1.0, %v241_v56 }
  0x2a   :  { %155 = vpow2.f32 %v42_v4  ;;  %v112_v60 = vadd.f32 %v111_v58, %v110_v57  ;;  %v122_v11 = vlaneseq  ;;  %p218_p5 = por %p217_p4, %p216_p3 }
  0x2b   :  { %157 = vpow2.f32 %v44_v5  ;;  %v82_v37 = vmul.f32 %v80_v22, %v80_v22  ;;  %v83_v42 = vmul.f32 %v81_v25, %v81_v25 }
  0x2c   :  { %v123_v12 = vshrl.u32 %v122_v11, 7  ;;  %p219_p6 = pnand %p218_p5, %p212_p2 }
  0x2e   :  { %vm125_vm8 = vcmp.eq.s32.totalorder %v123_v12, 1  ;;  %vm124_vm9 = vcmp.eq.s32.totalorder %v123_v12, 0 }
  0x34   :  { %v156_v6 = vpop.eup %155 }
  0x35   :  { %v158_v7 = vpop.eup %157  ;;  %v46_v8 = vadd.f32 1.0, %v156_v6 }
  0x36   :  { %v47_v9 = vadd.f32 1.0, %v158_v7 }
  0x37   :  { %159 = vrcp.f32 %v46_v8 }
  0x38   :  { %161 = vrcp.f32 %v47_v9 }
  0x39   :  { %163 = vlog2.f32 %v46_v8 }
  0x3a   :  { %165 = vlog2.f32 %v47_v9 }
  0x41   :  { %v160_v13 = vpop.eup %159 }
  0x42   :  { %v162_v15 = vpop.eup %161  ;;  %v54_v16 = vmax.f32 %v160_v13, 0.0001  ;;  %vm58_vm0 = vcmp.le.f32.partialorder %v160_v13, 0.0001  ;;  %vm60_vm1 = vcmp.ge.f32.partialorder %v160_v13, 0.9999 }
  0x43   :  { %v164_v17 = vpop.eup %163  ;;  %v55_v18 = vmax.f32 %v162_v15, 0.0001  ;;  %vm61_vm2 = vcmp.ge.f32.partialorder %v162_v15, 0.9999  ;;  %vm59_vm3 = vcmp.le.f32.partialorder %v162_v15, 0.0001 }
  0x44   :  { %v166_v19 = vpop.eup %165  ;;  %v51_v20 = vmul.f32 0.6931472, %v164_v17  ;;  %v56_v21 = vmin.f32 %v54_v16, 0.9999 }
  0x45   :  { %v53_v23 = vmul.f32 0.6931472, %v166_v19  ;;  %v57_v24 = vmin.f32 %v55_v18, 0.9999 }
  0x46   :  { %v62_v26 = vsub.f32 0.0, %v51_v20  ;;  %v68_v27 = vsub.f32 %v40_v2, %v51_v20  ;;  %v76_v28 = vsub.f32 1.0, %v56_v21 }
  0x47   :  { %v63_v29 = vsub.f32 0.0, %v53_v23  ;;  %v69_v30 = vsub.f32 %v41_v3, %v53_v23  ;;  %v77_v31 = vsub.f32 1.0, %v57_v24 }
  0x48   :  { %v64_v32 = vsel %vm60_vm1, -0.000100005, %v62_v26  ;;  %v70_v33 = vsel %vm60_vm1, -9.2103405, %v68_v27 }
  0x49   :  { %v65_v34 = vsel %vm61_vm2, -0.000100005, %v63_v29  ;;  %v66_v35 = vsel %vm58_vm0, -9.2103405, %v64_v32  ;;  %v71_v36 = vsel %vm61_vm2, -9.2103405, %v69_v30 }
  0x4a   :  { %v67_v38 = vsel %vm59_vm3, -9.2103405, %v65_v34  ;;  %v72_v39 = vsel %vm58_vm0, -0.000100005, %v70_v33  ;;  %v73_v40 = vsel %vm59_vm3, -0.000100005, %v71_v36  ;;  %v84_v41 = vmul.f32 %v76_v28, %v66_v35 }
  0x4b   :  { %v85_v43 = vmul.f32 %v77_v31, %v67_v38  ;;  %v90_v44 = vmul.f32 %v72_v39, %v56_v21  ;;  %v91_v45 = vmul.f32 %v73_v40, %v57_v24 }
  0x4c   :  { %v86_v48 = vmul.f32 %v84_v41, %v76_v28 }
  0x4d   :  { %v92_v46 = vmul.f32 %v90_v44, %v56_v21  ;;  %v93_v47 = vmul.f32 %v91_v45, %v57_v24  ;;  %v87_v49 = vmul.f32 %v85_v43, %v77_v31 }
  0x4f   :  { %v94_v50 = vmul.f32 %v92_v46, %v82_v37  ;;  %v95_v51 = vmul.f32 %v93_v47, %v83_v42 }
  0x51   :  { %v96_v52 = vsel %vm88_vm4, %v94_v50, 0.0  ;;  %v97_v53 = vsel %vm89_vm5, %v95_v51, 0.0 }
  0x52   :  { %v98_v54 = vsel %vm74_vm6, %v86_v48, %v96_v52  ;;  %v99_v55 = vsel %vm75_vm7, %v87_v49, %v97_v53 }
  0x53   :  { %v100_v59 = vadd.f32 %v99_v55, %v98_v54 }
  0x55   :  { %101 = vadd.xlane.f32.xlu0 %v100_v59 }
  0x59   :  { %113 = vadd.xlane.f32.xlu0 %v112_v60 }
  0xe2   :  { %v102_v61 = vpop.xlane.xlu0 %101 }
  0xe3   :  { %v103_v62 = vrot.slane %v102_v61, 4 }
  0xe5   :  { %v104_v63 = vadd.f32 %v103_v62, %v102_v61 }
  0xe6   :  { %v114_v0 = vpop.xlane.xlu0 %113 }
  0xe7   :  { %v105_v1 = vrot.slane %v104_v63, 2  ;;  %v115_v2 = vrot.slane %v114_v0, 4 }
  0xe9   :  { %v116_v3 = vadd.f32 %v115_v2, %v114_v0  ;;  %v106_v4 = vadd.f32 %v105_v1, %v104_v63 }
  0xeb   :  { %v117_v5 = vrot.slane %v116_v3, 2  ;;  %v107_v6 = vrot.slane %v106_v4, 1 }
  0xed   :  { %v118_v7 = vadd.f32 %v117_v5, %v116_v3  ;;  %v108_v8 = vadd.f32 %v107_v6, %v106_v4 }
  0xef   :  { %147 = vpush %v108_v8  ;;  %v119_v9 = vrot.slane %v118_v7, 1 }
  0xf1   :  { %v120_v10 = vadd.f32 %v119_v9, %v118_v7 }
  0xf3   :  { %149 = vpush %v120_v10 }
 0x120   :  { %s148_s1 = spop %147 }
 0x121   :  { %v128_v14 = vstv %s148_s1 }
 0x124   :  { %s150_s6 = spop %149 }
 0x125   :  { %v126_v13 = vstv %s150_s6 }
 0x126   :  { %v127_v15 = vsel %vm125_vm8, %v126_v13, 0.0 }
 0x127   :  { %v129_v16 = vsel %vm124_vm9, %v128_v14, %v127_v15 }
 0x128   :  { %130 = vst [vmem:[#allocation7] sm:$0xff] %v129_v16 }
 0x129   :  { %222 = shalt.err (!%p219_p6)
}
 0x12a   :  { %s223_s10 = scalar_lea.hbm %s298_s2, 128 }
 0x12b   :  { %p224_p7 = scmp.ne.s32.totalorder %s298_s2, %s223_s10  ;;  %p227_p8 = scmp.lt.u32.totalorder %s223_s10, %s298_s2 }
 0x12d   :  { %p229_p9 = pnand %p227_p8, %p224_p7 }
 0x12f   :  { %232 = shalt.err (!%p229_p9)
}
 0x130   :  { %140 = dma.vmem_to_hbm [thread:$0]  %s138_s5, 128, %s298_s2, [#allocation4]  }
 0x131   :  { %237 = dma.done.wait [#allocation4], 128  }
 0x132   :  { %238 = vsyncadd [#allocation4], 4294967168 }
 0x133   :  { %144 = vsyncpa [#allocation3], 1 }
 0x134   :  { %145 = vsyncpa [#allocation6], 1 }
 0x135   :  { %146 = vsyncpa [#allocation4], 1 }

</bundles_post_ra>
